<compile_context>
chip_gen: v6e
topology: v6e:2x2x1
jax: 0.10.0
libtpu: 0.0.40
codegen_flags: <defaults>
</compile_context>

<pallas_src>
import functools

import jax
import jax.numpy as jnp
from jax.experimental import pallas as pl
from jax.experimental.pallas import tpu as pltpu

_LANES = 512       # lane-dense last dim, multiple of 128
_ROW_TILE = 512    # max sublane tile; multiple of 8/16/32 for f32/bf16/int8


def _round_up(x, m):
    return ((x + m - 1) // m) * m


def _bubble_kernel(x_ref, o_ref, *, x_left, x_right):
    x = x_ref[...]
    o_ref[...] = (x - x_left) * (x_right - x)


def bubble(x, x_left=0.0, x_right=1.0):
    """Elementwise (x - x_left) * (x_right - x), same shape/dtype as x."""
    orig_shape = x.shape
    dtype = x.dtype
    n = int(x.size)

    # Flatten to a lane-dense 2-D slab [rows_padded, _LANES].
    lanes = _LANES
    rows = -(-n // lanes)  # ceil
    # Sublane packing requirement: 8 rows for 4-byte, 16 for 2-byte, 32 for 1-byte.
    sub = 32 // jnp.dtype(dtype).itemsize
    row_tile = min(_ROW_TILE, _round_up(rows, sub))
    rows_padded = _round_up(rows, row_tile)
    padded_n = rows_padded * lanes

    flat = x.reshape(-1)
    if padded_n != n:
        flat = jnp.pad(flat, (0, padded_n - n))
    x2d = flat.reshape(rows_padded, lanes)

    grid = (rows_padded // row_tile,)

    kernel = functools.partial(
        _bubble_kernel,
        x_left=float(x_left),
        x_right=float(x_right),
    )

    out2d = pl.pallas_call(
        kernel,
        out_shape=jax.ShapeDtypeStruct((rows_padded, lanes), dtype),
        grid=grid,
        in_specs=[pl.BlockSpec((row_tile, lanes), lambda i: (i, 0))],
        out_specs=pl.BlockSpec((row_tile, lanes), lambda i: (i, 0)),
        compiler_params=pltpu.CompilerParams(
            dimension_semantics=("parallel",)
        ),
    )(x2d)

    out = out2d.reshape(-1)
    if padded_n != n:
        out = out[:n]
    return out.reshape(orig_shape)


if __name__ == "__main__":
    key = jax.random.PRNGKey(0)

    # Small NCHW input consistent with typical module usage.
    x = jax.random.uniform(key, (2, 4, 16, 16), dtype=jnp.float32)
    out = bubble(x, x_left=0.0, x_right=1.0)
    out = jax.block_until_ready(out)

    ref = (x - 0.0) * (1.0 - x)
    assert out.shape == x.shape
    assert jnp.allclose(out, ref, atol=1e-6), "mismatch vs reference"

    # Extra check: non-divisible shape exercises the pad/slice path and
    # non-default bounds.
    x2 = jax.random.uniform(jax.random.PRNGKey(1), (3, 5, 7), dtype=jnp.float32)
    out2 = jax.block_until_ready(bubble(x2, x_left=-0.5, x_right=2.0))
    ref2 = (x2 - (-0.5)) * (2.0 - x2)
    assert out2.shape == x2.shape
    assert jnp.allclose(out2, ref2, atol=1e-6), "mismatch vs reference (padded)"

    print("KERNEL_OK")
</pallas_src>

<mosaic_0001>
module attributes {stable_mosaic.version = 11 : i64} {
  func.func @_bubble_kernel(%arg0: i32, %arg1: memref<8x512xf32, #tpu.memory_space<vmem>>, %arg2: memref<8x512xf32, #tpu.memory_space<vmem>>) attributes {dimension_semantics = [#tpu.dimension_semantics<parallel>], iteration_bounds = array<i64: 1>, scalar_prefetch = 0 : i64, scratch_operands = 0 : i64, tpu.core_type = #tpu.core_type<tc>, window_params = [{transform_indices = @transform_0, window_bounds = array<i64: 8, 512>}, {transform_indices = @transform_1, window_bounds = array<i64: 8, 512>}]} {
    %c0 = arith.constant 0 : index
    %c0_0 = arith.constant 0 : index
    %0 = vector.load %arg1[%c0, %c0_0] : memref<8x512xf32, #tpu.memory_space<vmem>>, vector<8x512xf32>
    %cst = arith.constant 0.000000e+00 : f32
    %1 = vector.broadcast %cst : f32 to vector<8x512xf32>
    %2 = arith.subf %0, %1 : vector<8x512xf32>
    %cst_1 = arith.constant 1.000000e+00 : f32
    %3 = vector.broadcast %cst_1 : f32 to vector<8x512xf32>
    %4 = arith.subf %3, %0 : vector<8x512xf32>
    %5 = arith.mulf %2, %4 : vector<8x512xf32>
    %c0_2 = arith.constant 0 : index
    %c0_3 = arith.constant 0 : index
    %6 = vector.load %arg2[%c0_2, %c0_3] : memref<8x512xf32, #tpu.memory_space<vmem>>, vector<8x512xf32>
    tpu.vector_store %arg2[%c0_2, %c0_3], %5 {strides = array<i32>} : memref<8x512xf32, #tpu.memory_space<vmem>>, vector<8x512xf32>,
    return
  }
  func.func @transform_0(%arg0: i32) -> (i32, i32) {
    %c0_i32 = arith.constant 0 : i32
    %c0_i32_0 = arith.constant 0 : i32
    return %arg0, %c0_i32 : i32, i32
  }
  func.func @transform_1(%arg0: i32) -> (i32, i32) {
    %c0_i32 = arith.constant 0 : i32
    %c0_i32_0 = arith.constant 0 : i32
    return %arg0, %c0_i32 : i32, i32
  }
}

</mosaic_0001>

<bundles_post_ra>
// kernel: tpu_custom_call.1
= control target key start
LH: loop header
LB: loop body
LE: loop exit
PB: predicated region body
PF: predicated region fallthrough
CT: control target
= control target key end

     0   :  { %6 = vsyncpa [#allocation3], 0  ;;  %s116_s0 = inlined_call_operand.hbm [shape: f32[8,512], index: 0, kind: input, shape index: {}]   ;;  %s117_s1 = inlined_call_operand.hbm [shape: f32[8,512], index: 1, kind: output, shape index: {}]  }
   0x1   :  { %7 = vsyncpa [#allocation4], 0  ;;  %s98_s6 = smov [#allocation2]  }
   0x2   :  { %s14_s7 = sshll.u32 %s98_s6, 4  ;;  %s15_s7 = int_to_ptr.vmem [resolvable:$true] %s14_s7 }
   0x3   :  { %s62_s8 = scalar_lea.vmem %s15_s7, 512  ;;  %p67_p1 = scmp.lt.s32.totalorder %s15_s7, %s15_s7 }
   0x4   :  { %p63_p0 = scmp.ne.s32.totalorder %s15_s7, %s62_s8  ;;  %p68_p2 = scmp.lt.s32.totalorder %s62_s8, %s62_s8 }
   0x6   :  { %p69_p3 = por %p68_p2, %p67_p1 }
   0x8   :  { %p70_p4 = pnand %p69_p3, %p63_p0 }
   0xa   :  { %73 = shalt.err (!%p70_p4)
}
   0xb   :  { %17 = dma.hbm_to_vmem [thread:$0]  %s116_s0, 512, %s15_s7, [#allocation3]  }
   0xc   :  { %94 = dma.done.wait [#allocation3], 512  }
   0xd   :  { %95 = vsyncadd [#allocation3], 4294966784  ;;  %v21_v0 = vld [vmem:[#allocation2] sm:$0xff]  ;;  %v22_v1 = vld [vmem:[#allocation2 + $0x8] sm:$0xff]  ;;  %s99_s11 = smov [#allocation5]  }
   0xe   :  { %v23_v2 = vld [vmem:[#allocation2 + $0x10] sm:$0xff]  ;;  %v25_v3 = vsub.f32 1.0, %v21_v0  ;;  %v26_v4 = vsub.f32 1.0, %v22_v1  ;;  %v24_v6 = vld [vmem:[#allocation2 + $0x18] sm:$0xff]  ;;  %s43_s12 = sshll.u32 %s99_s11, 4  ;;  %s44_s12 = int_to_ptr.vmem [resolvable:$true] %s43_s12 }
   0xf   :  { %v27_v5 = vsub.f32 1.0, %v23_v2  ;;  %v28_v7 = vsub.f32 1.0, %v24_v6  ;;  %s74_s0 = scalar_lea.vmem %s44_s12, 512  ;;  %p79_p6 = scmp.lt.s32.totalorder %s44_s12, %s44_s12 }
  0x10   :  { %v29_v8 = vmul.f32 %v25_v3, %v21_v0  ;;  %v30_v9 = vmul.f32 %v26_v4, %v22_v1  ;;  %p75_p5 = scmp.ne.s32.totalorder %s44_s12, %s74_s0  ;;  %p80_p7 = scmp.lt.s32.totalorder %s74_s0, %s74_s0 }
  0x11   :  { %v31_v10 = vmul.f32 %v27_v5, %v23_v2  ;;  %v32_v11 = vmul.f32 %v28_v7, %v24_v6 }
  0x12   :  { %33 = vst [vmem:[#allocation5] sm:$0xff] %v29_v8  ;;  %34 = vst [vmem:[#allocation5 + $0x8] sm:$0xff] %v30_v9  ;;  %p81_p8 = por %p80_p7, %p79_p6 }
  0x13   :  { %35 = vst [vmem:[#allocation5 + $0x10] sm:$0xff] %v31_v10  ;;  %36 = vst [vmem:[#allocation5 + $0x18] sm:$0xff] %v32_v11 }
  0x14   :  { %p82_p9 = pnand %p81_p8, %p75_p5 }
  0x16   :  { %85 = shalt.err (!%p82_p9)
}
  0x17   :  { %46 = dma.vmem_to_hbm [thread:$0]  %s44_s12, 512, %s117_s1, [#allocation4]  }
  0x18   :  { %96 = dma.done.wait [#allocation4], 512  }
  0x19   :  { %97 = vsyncadd [#allocation4], 4294966784 }
  0x1a   :  { %50 = vsyncpa [#allocation3], 1 }
  0x1b   :  { %51 = vsyncpa [#allocation4], 1 }

</bundles_post_ra>
